<compile_context>
chip_gen: v7x
topology: tpu7x:2x2x1
jax: 0.10.0
libtpu: 0.0.40
codegen_flags: <defaults>
</compile_context>

<pallas_src>
import functools

import jax
import jax.numpy as jnp
from jax.experimental import pallas as pl
from jax.experimental.pallas import tpu as pltpu

_MIB = 1024 * 1024


def convseq_kernel(x_ref, w_ref, b_ref, o_ref, cur_ref, *,
                   num_cnns, kernel_size, add_residual, fold_taps, lpad):
    """One grid step = one (TB, S, D) batch tile; all L layers computed locally."""
    TB, S, D = x_ref.shape
    pad = (kernel_size - 1) // 2
    base = lpad - pad                  # first tap's start row inside the padded scratch
    rows = TB * S

    # Zero the halo rows around the center.  The scratch is uninitialized and, with
    # a "parallel" grid axis, each core owns its own copy, so no program_id gating.
    if pad > 0:
        cur_ref[:, base:lpad, :] = jnp.zeros((TB, pad, D), cur_ref.dtype)
        cur_ref[:, lpad + S:lpad + S + pad, :] = jnp.zeros((TB, pad, D), cur_ref.dtype)

    # Layer-0 input -> compute dtype, stored at the sublane-aligned center.
    cur_ref[:, lpad:lpad + S, :] = x_ref[...].astype(cur_ref.dtype)

    for l in range(num_cnns):                          # layers: static unroll
        # f32 accumulator initialized with the broadcast bias (one broadcast/layer).
        acc = jnp.broadcast_to(b_ref[l], (rows, D))    # b_ref[l]: (1, D) f32

        if fold_taps:
            # im2col along lanes: one matmul per layer with a K*D-deep contraction.
            xs = jnp.concatenate(
                [cur_ref[:, base + dk:base + dk + S, :] for dk in range(kernel_size)],
                axis=-1).reshape(rows, kernel_size * D)
            acc = acc + jnp.dot(xs, w_ref[l], preferred_element_type=jnp.float32)
        else:
            for dk in range(kernel_size):              # taps: static unroll
                xs = cur_ref[:, base + dk:base + dk + S, :].reshape(rows, D)
                acc = acc + jnp.dot(xs, w_ref[l, dk],
                                    preferred_element_type=jnp.float32)

        # Epilogue in f32: ReLU (+ residual re-read from the scratch center instead
        # of a register-carried (TB,S,D) live value).
        out = jnp.maximum(acc, 0.0).reshape(TB, S, D)
        if add_residual:
            out = out + cur_ref[:, lpad:lpad + S, :].astype(jnp.float32)

        if l == num_cnns - 1:
            o_ref[...] = out.astype(o_ref.dtype)       # last layer: write output only
        else:
            cur_ref[:, lpad:lpad + S, :] = out.astype(cur_ref.dtype)  # aligned store


def _resident_spec(block_shape, index_map, nbytes):
    """BlockSpec for operands whose block index never changes (weights / bias).

    They are fetched once either way; for large operands also drop the second
    pipeline buffer (halves resident weight VMEM — important on v7x's 64 MiB)."""
    if nbytes > 4 * _MIB:
        try:
            return pl.BlockSpec(block_shape, index_map, pipeline_mode=pl.Buffered(1))
        except (TypeError, AttributeError):   # older jax without pipeline_mode
            pass
    return pl.BlockSpec(block_shape, index_map)


def _auto_block_batch(B, S, sub, working_set_bytes, budget_bytes, target_rows=1024):
    """Largest batch tile that (a) fits the VMEM budget, (b) leaves >= 2 grid steps
    when possible (megacore), (c) stops growing once ~target_rows matmul rows."""
    if S % sub != 0:
        return 1          # keep the (TB, S, D) -> (TB*S, D) flatten relayout-free
    divs = [d for d in range(1, B + 1) if B % d == 0]
    fitting = [d for d in divs if working_set_bytes(d) <= budget_bytes] or [1]
    pref = [d for d in fitting if B // d >= 2] or fitting
    big = [d for d in pref if d * S >= target_rows]
    return min(big) if big else max(pref)


def convseq_forward(x, w, b, *, kernel_size, add_residual=True,
                    compute_dtype=jnp.bfloat16, block_batch=None,
                    fold_taps=None, vmem_budget_bytes=32 * _MIB):
    """x: (B, S, D); w: (L, K, D, D); b: (L, 1, D) -> (B, S, D)."""
    B, S, D = x.shape
    L = w.shape[0]
    assert kernel_size % 2 == 1 and kernel_size > 0, \
        "ConvSeq requires odd kernel_size (same-length output)"
    assert w.shape == (L, kernel_size, D, D)
    assert b.shape == (L, 1, D)
    if L == 0:
        return x                                       # degenerate config: identity

    compute_dtype = jnp.dtype(compute_dtype)
    csize = compute_dtype.itemsize
    pad = (kernel_size - 1) // 2
    sub = 8 * (4 // csize)                             # sublane tile: 8 f32 / 16 bf16
    lpad = ((pad + sub - 1) // sub) * sub if pad > 0 else 0
    halo_rows = lpad + S + pad

    if fold_taps is None:
        fold_taps = D <= 128      # folding pays when D alone underfills the MXU depth

    # Host-side operand prep: compute-dtype matmul operands, f32 bias.
    w_c = w.astype(compute_dtype)
    if fold_taps:
        w_c = w_c.reshape(L, kernel_size * D, D)       # fold (K, D_in) into contraction
    b_c = b.astype(jnp.float32)

    weight_bytes = L * kernel_size * D * D * csize
    bias_bytes = L * D * 4

    def working_set_bytes(tb):
        io = 4 * tb * S * D * x.dtype.itemsize         # 2x in + 2x out, double-buffered
        scratch = tb * halo_rows * D * csize           # padded activation scratch
        return io + scratch + 2 * weight_bytes + 2 * bias_bytes

    if block_batch is None:
        block_batch = _auto_block_batch(B, S, sub, working_set_bytes,
                                        vmem_budget_bytes)
    assert B % block_batch == 0
    TB = block_batch

    kernel = functools.partial(
        convseq_kernel, num_cnns=L, kernel_size=kernel_size,
        add_residual=add_residual, fold_taps=fold_taps, lpad=lpad)

    flops = 2 * L * kernel_size * B * S * D * D
    bytes_accessed = int(2 * B * S * D * x.dtype.itemsize
                         + w_c.size * csize + b_c.size * 4)
    cost = pl.CostEstimate(flops=flops, transcendentals=0,
                           bytes_accessed=bytes_accessed)

    # Raise the scoped VMEM limit above the 16/32 MiB defaults (v5e/v6e) but stay
    # within v7x's 64 MiB physical VMEM.
    need = working_set_bytes(TB)
    vmem_limit = int(min(max(need + need // 4 + _MIB, 32 * _MIB), 64 * _MIB))

    if fold_taps:
        w_spec = _resident_spec((L, kernel_size * D, D),
                                lambda i: (0, 0, 0), weight_bytes)
    else:
        w_spec = _resident_spec((L, kernel_size, D, D),
                                lambda i: (0, 0, 0, 0), weight_bytes)

    grid = (B // TB,)
    return pl.pallas_call(
        kernel,
        out_shape=jax.ShapeDtypeStruct((B, S, D), x.dtype),
        grid=grid,
        in_specs=[
            pl.BlockSpec((TB, S, D), lambda i: (i, 0, 0)),
            w_spec,
            _resident_spec((L, 1, D), lambda i: (0, 0, 0), bias_bytes),
        ],
        out_specs=pl.BlockSpec((TB, S, D), lambda i: (i, 0, 0)),
        scratch_shapes=[
            pltpu.VMEM((TB, halo_rows, D), compute_dtype),   # zero-halo activations
        ],
        compiler_params=pltpu.CompilerParams(
            dimension_semantics=("parallel",),
            vmem_limit_bytes=vmem_limit),
        cost_estimate=cost,
    )(x, w_c, b_c)


def convseq_ref(x, w, b, *, kernel_size, add_residual=True,
                compute_dtype=jnp.float32):
    """Pure-JAX reference mirroring the kernel's rounding points."""
    B, S, D = x.shape
    L = w.shape[0]
    pad = (kernel_size - 1) // 2
    cur = x.astype(compute_dtype)
    out = x.astype(jnp.float32)
    for l in range(L):
        xp = jnp.pad(cur, ((0, 0), (pad, pad), (0, 0)))
        acc = jnp.broadcast_to(b[l].reshape(1, 1, D).astype(jnp.float32), (B, S, D))
        for dk in range(kernel_size):
            acc = acc + jnp.einsum('bnd,de->bne', xp[:, dk:dk + S, :],
                                   w[l, dk].astype(compute_dtype),
                                   preferred_element_type=jnp.float32)
        out = jnp.maximum(acc, 0.0)
        if add_residual:
            out = out + cur.astype(jnp.float32)
        cur = out.astype(compute_dtype)
    return out.astype(x.dtype)


if __name__ == "__main__":
    # Small shapes consistent with ConvSeq(in_dim=32, num_cnns=2, kernel_size=3)
    B, S, D = 2, 16, 32
    L, K = 2, 3

    key = jax.random.PRNGKey(0)
    kx, kw, kb = jax.random.split(key, 3)
    x = jax.random.normal(kx, (B, S, D), dtype=jnp.float32)

    # Conv2d-like uniform(-1/sqrt(fan_in), +) init; fan_in = 1 * K * D
    bound = 1.0 / float((K * D) ** 0.5)
    w = jax.random.uniform(kw, (L, K, D, D), minval=-bound, maxval=bound,
                           dtype=jnp.float32)
    b = jax.random.uniform(kb, (L, 1, D), minval=-bound, maxval=bound,
                           dtype=jnp.float32)

    # 1) Exactness of the algorithm: f32 compute path vs pure-JAX f32 reference.
    out_f32 = jax.block_until_ready(
        convseq_forward(x, w, b, kernel_size=K, add_residual=True,
                        compute_dtype=jnp.float32))
    ref_f32 = convseq_ref(x, w, b, kernel_size=K, add_residual=True,
                          compute_dtype=jnp.float32)
    assert out_f32.shape == (B, S, D)
    assert jnp.allclose(out_f32, ref_f32, atol=1e-5, rtol=1e-5), \
        "mismatch vs reference (f32 compute path)"

    # 2) Default fast path (bf16 MXU operands, f32 accumulation) vs matched reference.
    out_bf = jax.block_until_ready(
        convseq_forward(x, w, b, kernel_size=K, add_residual=True))
    ref_bf = convseq_ref(x, w, b, kernel_size=K, add_residual=True,
                         compute_dtype=jnp.bfloat16)
    assert jnp.allclose(out_bf, ref_bf, atol=2e-2, rtol=2e-2), \
        "mismatch vs reference (bf16 compute path)"

    # 3) No-residual configuration.
    out_nr = jax.block_until_ready(
        convseq_forward(x, w, b, kernel_size=K, add_residual=False))
    ref_nr = convseq_ref(x, w, b, kernel_size=K, add_residual=False,
                         compute_dtype=jnp.bfloat16)
    assert jnp.allclose(out_nr, ref_nr, atol=2e-2, rtol=2e-2), \
        "mismatch vs reference (no residual)"

    print("KERNEL_OK")
</pallas_src>

<mosaic_0001>
module attributes {stable_mosaic.version = 11 : i64} {
  func.func @convseq_kernel(%arg0: i32, %arg1: memref<1x16x32xf32, #tpu.memory_space<vmem>>, %arg2: memref<2x96x32xf32, #tpu.memory_space<vmem>>, %arg3: memref<2x1x32xf32, #tpu.memory_space<vmem>>, %arg4: memref<1x16x32xf32, #tpu.memory_space<vmem>>, %arg5: memref<1x25x32xf32, #tpu.memory_space<vmem>>) attributes {dimension_semantics = [#tpu.dimension_semantics<parallel>], iteration_bounds = array<i64: 2>, scalar_prefetch = 0 : i64, scratch_operands = 1 : i64, tpu.core_type = #tpu.core_type<tc>, window_params = [{transform_indices = @transform_0, window_bounds = array<i64: 1, 16, 32>}, {pipeline_mode = #tpu.pipeline_mode<synchronous>, transform_indices = @transform_1, window_bounds = array<i64: 2, 96, 32>}, {pipeline_mode = #tpu.pipeline_mode<synchronous>, transform_indices = @transform_2, window_bounds = array<i64: 2, 1, 32>}, {transform_indices = @transform_3, window_bounds = array<i64: 1, 16, 32>}]} {
    %cst = arith.constant 0.000000e+00 : f32
    %0 = vector.broadcast %cst : f32 to vector<1x1x32xf32>
    %c0 = arith.constant 0 : index
    %c7 = arith.constant 7 : index
    %c0_0 = arith.constant 0 : index
    %1 = vector.load %arg5[%c0, %c7, %c0_0] : memref<1x25x32xf32, #tpu.memory_space<vmem>>, vector<1x1x32xf32>
    tpu.vector_store %arg5[%c0, %c7, %c0_0], %0 {strides = array<i32>} : memref<1x25x32xf32, #tpu.memory_space<vmem>>, vector<1x1x32xf32>,
    %cst_1 = arith.constant 0.000000e+00 : f32
    %2 = vector.broadcast %cst_1 : f32 to vector<1x1x32xf32>
    %c0_2 = arith.constant 0 : index
    %c24 = arith.constant 24 : index
    %c0_3 = arith.constant 0 : index
    %3 = vector.load %arg5[%c0_2, %c24, %c0_3] : memref<1x25x32xf32, #tpu.memory_space<vmem>>, vector<1x1x32xf32>
    tpu.vector_store %arg5[%c0_2, %c24, %c0_3], %2 {strides = array<i32>} : memref<1x25x32xf32, #tpu.memory_space<vmem>>, vector<1x1x32xf32>,
    %c0_4 = arith.constant 0 : index
    %c0_5 = arith.constant 0 : index
    %c0_6 = arith.constant 0 : index
    %4 = vector.load %arg1[%c0_4, %c0_5, %c0_6] : memref<1x16x32xf32, #tpu.memory_space<vmem>>, vector<1x16x32xf32>
    %c0_7 = arith.constant 0 : index
    %c8 = arith.constant 8 : index
    %c0_8 = arith.constant 0 : index
    %5 = vector.load %arg5[%c0_7, %c8, %c0_8] : memref<1x25x32xf32, #tpu.memory_space<vmem>>, vector<1x16x32xf32>
    tpu.vector_store %arg5[%c0_7, %c8, %c0_8], %4 {strides = array<i32>} : memref<1x25x32xf32, #tpu.memory_space<vmem>>, vector<1x16x32xf32>,
    %c0_9 = arith.constant 0 : index
    %c0_10 = arith.constant 0 : index
    %c0_11 = arith.constant 0 : index
    %6 = vector.load %arg3[%c0_9, %c0_10, %c0_11] : memref<2x1x32xf32, #tpu.memory_space<vmem>>, vector<1x1x32xf32>
    %7 = vector.shape_cast %6 : vector<1x1x32xf32> to vector<1x32xf32>
    %8 = vector.shape_cast %7 : vector<1x32xf32> to vector<1x32xf32>
    %9 = vector.broadcast %8 : vector<1x32xf32> to vector<16x32xf32>
    %c0_12 = arith.constant 0 : index
    %c7_13 = arith.constant 7 : index
    %c0_14 = arith.constant 0 : index
    %10 = vector.load %arg5[%c0_12, %c7_13, %c0_14] : memref<1x25x32xf32, #tpu.memory_space<vmem>>, vector<1x16x32xf32>
    %c0_15 = arith.constant 0 : index
    %c8_16 = arith.constant 8 : index
    %c0_17 = arith.constant 0 : index
    %11 = vector.load %arg5[%c0_15, %c8_16, %c0_17] : memref<1x25x32xf32, #tpu.memory_space<vmem>>, vector<1x16x32xf32>
    %c0_18 = arith.constant 0 : index
    %c9 = arith.constant 9 : index
    %c0_19 = arith.constant 0 : index
    %12 = vector.load %arg5[%c0_18, %c9, %c0_19] : memref<1x25x32xf32, #tpu.memory_space<vmem>>, vector<1x16x32xf32>
    %13 = tpu.concatenate %10, %11, %12 in 2 : vector<1x16x32xf32>, vector<1x16x32xf32>, vector<1x16x32xf32> -> vector<1x16x96xf32>
    %14 = vector.shape_cast %13 : vector<1x16x96xf32> to vector<16x96xf32>
    %c0_20 = arith.constant 0 : index
    %c0_21 = arith.constant 0 : index
    %c0_22 = arith.constant 0 : index
    %15 = vector.load %arg2[%c0_20, %c0_21, %c0_22] : memref<2x96x32xf32, #tpu.memory_space<vmem>>, vector<1x96x32xf32>
    %16 = vector.shape_cast %15 : vector<1x96x32xf32> to vector<96x32xf32>
    %cst_23 = arith.constant dense<0.000000e+00> : vector<16x32xf32>
    %17 = tpu.matmul %14, %16, %cst_23 {dimension_numbers = #tpu.dot_dimension_numbers<[1], [0], [0], [1], [0, 0, 1, 1], [], []>} : vector<16x96xf32>, vector<96x32xf32>, vector<16x32xf32> -> vector<16x32xf32>
    %18 = arith.addf %9, %17 : vector<16x32xf32>
    %cst_24 = arith.constant 0.000000e+00 : f32
    %19 = vector.broadcast %cst_24 : f32 to vector<16x32xf32>
    %20 = arith.maximumf %18, %19 : vector<16x32xf32>
    %21 = vector.shape_cast %20 : vector<16x32xf32> to vector<1x16x32xf32>
    %c0_25 = arith.constant 0 : index
    %c8_26 = arith.constant 8 : index
    %c0_27 = arith.constant 0 : index
    %22 = vector.load %arg5[%c0_25, %c8_26, %c0_27] : memref<1x25x32xf32, #tpu.memory_space<vmem>>, vector<1x16x32xf32>
    %23 = arith.addf %21, %22 : vector<1x16x32xf32>
    %c0_28 = arith.constant 0 : index
    %c8_29 = arith.constant 8 : index
    %c0_30 = arith.constant 0 : index
    %24 = vector.load %arg5[%c0_28, %c8_29, %c0_30] : memref<1x25x32xf32, #tpu.memory_space<vmem>>, vector<1x16x32xf32>
    tpu.vector_store %arg5[%c0_28, %c8_29, %c0_30], %23 {strides = array<i32>} : memref<1x25x32xf32, #tpu.memory_space<vmem>>, vector<1x16x32xf32>,
    %c1 = arith.constant 1 : index
    %c0_31 = arith.constant 0 : index
    %c0_32 = arith.constant 0 : index
    %25 = vector.load %arg3[%c1, %c0_31, %c0_32] : memref<2x1x32xf32, #tpu.memory_space<vmem>>, vector<1x1x32xf32>
    %26 = vector.shape_cast %25 : vector<1x1x32xf32> to vector<1x32xf32>
    %27 = vector.shape_cast %26 : vector<1x32xf32> to vector<1x32xf32>
    %28 = vector.broadcast %27 : vector<1x32xf32> to vector<16x32xf32>
    %c0_33 = arith.constant 0 : index
    %c7_34 = arith.constant 7 : index
    %c0_35 = arith.constant 0 : index
    %29 = vector.load %arg5[%c0_33, %c7_34, %c0_35] : memref<1x25x32xf32, #tpu.memory_space<vmem>>, vector<1x16x32xf32>
    %c0_36 = arith.constant 0 : index
    %c8_37 = arith.constant 8 : index
    %c0_38 = arith.constant 0 : index
    %30 = vector.load %arg5[%c0_36, %c8_37, %c0_38] : memref<1x25x32xf32, #tpu.memory_space<vmem>>, vector<1x16x32xf32>
    %c0_39 = arith.constant 0 : index
    %c9_40 = arith.constant 9 : index
    %c0_41 = arith.constant 0 : index
    %31 = vector.load %arg5[%c0_39, %c9_40, %c0_41] : memref<1x25x32xf32, #tpu.memory_space<vmem>>, vector<1x16x32xf32>
    %32 = tpu.concatenate %29, %30, %31 in 2 : vector<1x16x32xf32>, vector<1x16x32xf32>, vector<1x16x32xf32> -> vector<1x16x96xf32>
    %33 = vector.shape_cast %32 : vector<1x16x96xf32> to vector<16x96xf32>
    %c1_42 = arith.constant 1 : index
    %c0_43 = arith.constant 0 : index
    %c0_44 = arith.constant 0 : index
    %34 = vector.load %arg2[%c1_42, %c0_43, %c0_44] : memref<2x96x32xf32, #tpu.memory_space<vmem>>, vector<1x96x32xf32>
    %35 = vector.shape_cast %34 : vector<1x96x32xf32> to vector<96x32xf32>
    %cst_45 = arith.constant dense<0.000000e+00> : vector<16x32xf32>
    %36 = tpu.matmul %33, %35, %cst_45 {dimension_numbers = #tpu.dot_dimension_numbers<[1], [0], [0], [1], [0, 0, 1, 1], [], []>} : vector<16x96xf32>, vector<96x32xf32>, vector<16x32xf32> -> vector<16x32xf32>
    %37 = arith.addf %28, %36 : vector<16x32xf32>
    %cst_46 = arith.constant 0.000000e+00 : f32
    %38 = vector.broadcast %cst_46 : f32 to vector<16x32xf32>
    %39 = arith.maximumf %37, %38 : vector<16x32xf32>
    %40 = vector.shape_cast %39 : vector<16x32xf32> to vector<1x16x32xf32>
    %c0_47 = arith.constant 0 : index
    %c8_48 = arith.constant 8 : index
    %c0_49 = arith.constant 0 : index
    %41 = vector.load %arg5[%c0_47, %c8_48, %c0_49] : memref<1x25x32xf32, #tpu.memory_space<vmem>>, vector<1x16x32xf32>
    %42 = arith.addf %40, %41 : vector<1x16x32xf32>
    %c0_50 = arith.constant 0 : index
    %c0_51 = arith.constant 0 : index
    %c0_52 = arith.constant 0 : index
    %43 = vector.load %arg4[%c0_50, %c0_51, %c0_52] : memref<1x16x32xf32, #tpu.memory_space<vmem>>, vector<1x16x32xf32>
    tpu.vector_store %arg4[%c0_50, %c0_51, %c0_52], %42 {strides = array<i32>} : memref<1x16x32xf32, #tpu.memory_space<vmem>>, vector<1x16x32xf32>,
    return
  }
  func.func @transform_0(%arg0: i32) -> (i32, i32, i32) {
    %c0_i32 = arith.constant 0 : i32
    %c0_i32_0 = arith.constant 0 : i32
    %c0_i32_1 = arith.constant 0 : i32
    return %arg0, %c0_i32, %c0_i32_0 : i32, i32, i32
  }
  func.func @transform_1(%arg0: i32) -> (i32, i32, i32) {
    %c0_i32 = arith.constant 0 : i32
    %c0_i32_0 = arith.constant 0 : i32
    %c0_i32_1 = arith.constant 0 : i32
    %c0_i32_2 = arith.constant 0 : i32
    return %c0_i32, %c0_i32_0, %c0_i32_1 : i32, i32, i32
  }
  func.func @transform_2(%arg0: i32) -> (i32, i32, i32) {
    %c0_i32 = arith.constant 0 : i32
    %c0_i32_0 = arith.constant 0 : i32
    %c0_i32_1 = arith.constant 0 : i32
    %c0_i32_2 = arith.constant 0 : i32
    return %c0_i32, %c0_i32_0, %c0_i32_1 : i32, i32, i32
  }
  func.func @transform_3(%arg0: i32) -> (i32, i32, i32) {
    %c0_i32 = arith.constant 0 : i32
    %c0_i32_0 = arith.constant 0 : i32
    %c0_i32_1 = arith.constant 0 : i32
    return %arg0, %c0_i32, %c0_i32_0 : i32, i32, i32
  }
}

</mosaic_0001>

<bundles_post_ra>
// kernel: tpu_custom_call.1
= control target key start
LH: loop header
LB: loop body
LE: loop exit
PB: predicated region body
PF: predicated region fallthrough
CT: control target
= control target key end

     0   :  { %8 = vsyncpa [#allocation4], 0  ;;  %s1033_s0 = inlined_call_operand.vmem [shape: f32[2,16,32], index: 0, kind: input, shape index: {}]   ;;  %s1034_s1 = inlined_call_operand.vmem [shape: f32[2,96,32], index: 1, kind: input, shape index: {}]   ;;  %s1035_s2 = inlined_call_operand.vmem [shape: f32[2,1,32], index: 2, kind: input, shape index: {}]   ;;  %s1036_s3 = inlined_call_operand.hbm [shape: f32[2,16,32], index: 3, kind: output, shape index: {}]  }
   0x1   :  { %10 = vsyncpa [#allocation4 + $0x1], 0  ;;  %s822_s12 = smov 0   ;;  %s824_s13 = smov 0  }
   0x2   :  { %s826_s14 = smov 0   ;;  %s828_s15 = smov 0  }
   0x3 LB: > { %s843_s16 = sadd.s32 4294967295, %s794_s15   ;;  %s525_s17 = sadd.s32 4294967294, %s794_s15   ;;  %s794_s15 = sphi %s828_s15, %s1042_s15   ;;  %s790_s14 = sphi %s826_s14, %s1041_s14   ;;  %s786_s13 = sphi %s824_s13, %s1040_s13   ;;  %s782_s12 = sphi %s822_s12, %s1039_s12  }
   0x4   : > { %s847_s18 = sadd.s32 1, %s794_s15   ;;  %s91_s19 = sadd.s32 1, %s790_s14 }
   0x5   : > { %s88_s20 = ssub.s32 %s794_s15, %s847_s18  ;;  %p101_p0 = scmp.ne.s32.totalorder %s790_s14, %s786_s13 }
   0x6   : > { %p89_p1 = scmp.eq.s32.totalorder %s88_s20, 0  ;;  %p102_p2 = scmp.eq.s32.totalorder %s843_s16, 1 }
   0x7   : > { %p107_p3 = scmp.ne.s32.totalorder %s786_s13, %s782_s12  ;;  %p108_p4 = scmp.eq.s32.totalorder %s525_s17, 1 }
   0x8   : > { %s858_s21 = scalar_select %p89_p1, %s790_s14, %s91_s19  }
   0x9   : > { %p860_p5 = por %p102_p2, %p101_p0  ;;  %p864_p6 = por %p108_p4, %p107_p3 }
   0xa   : > { %p528_p7 = scmp.ge.s32.totalorder %s794_s15, 1  ;;  %p140_p8 = scmp.lt.s32.totalorder %s794_s15, 3 }
   0xc   : > { %p141_p9 = pnand %p528_p7, %p140_p8 }
   0xd   : > { %p164_p10 = scmp.lt.s32.totalorder (!%p141_p9), %s843_s16, 1  ;;  %vm169_vm0 = vcmask (!%p141_p9), 253952   ;;  %v211_v0 = vld [vmem:[%s1034_s1] sm:$0xff] (!%p141_p9)  ;;  %v796_v1 = vmov (!%p141_p9), 0.0   ;;  %v212_v2 = vld [vmem:[%s1034_s1 + $0x8] sm:$0xff] (!%p141_p9)  ;;  %v213_v3 = vld [vmem:[%s1034_s1 + $0x10] sm:$0xff] (!%p141_p9) }
   0xe   : > { %144 = sbr.rel (%p141_p9) target bundleno = 737 (0x2e1), region = 32  ;;  %170 = vst.msk [vmem:[#allocation2 + $0x7] sm:$0x1] (!%p141_p9), %vm169_vm0, %v796_v1  ;;  %171 = vst.msk [vmem:[#allocation2 + $0x18] sm:$0x1] (!%p141_p9), %vm169_vm0, %v796_v1  ;;  %v214_v4 = vld [vmem:[%s1034_s1 + $0x18] sm:$0xff] (!%p141_p9)  ;;  %v640_v5 = vpack.c.bf16 (!%p141_p9), %v212_v2, %v211_v0 }
   0xf   : > { %v644_v6 = vpack.c.bf16 (!%p141_p9), %v214_v4, %v213_v3  ;;  %v215_v7 = vld [vmem:[%s1034_s1 + $0x20] sm:$0xff] (!%p141_p9)  ;;  %v216_v8 = vld [vmem:[%s1034_s1 + $0x28] sm:$0xff] (!%p141_p9)  ;;  %vm174_vm1 = vcmask (!%p141_p9), 261120   ;;  %v217_v12 = vld [vmem:[%s1034_s1 + $0x30] sm:$0xff] (!%p141_p9)  ;;  %s797_s4 = smov (!%p141_p9), 32   ;;  %vm208_vm2 = vcmask (!%p141_p9), 523264  }
  0x10   : > { %641 = vmatprep.subr.bf16.mxu0 (!%p141_p9), %v640_v5  ;;  %v648_v11 = vpack.c.bf16 (!%p141_p9), %v216_v8, %v215_v7  ;;  %v218_v13 = vld [vmem:[%s1034_s1 + $0x38] sm:$0xff] (!%p141_p9)  ;;  %v219_v15 = vld [vmem:[%s1034_s1 + $0x40] sm:$0xff] (!%p141_p9)  ;;  %v220_v16 = vld [vmem:[%s1034_s1 + $0x48] sm:$0xff] (!%p141_p9)  ;;  %vm223_vm3 = vcmask (!%p141_p9), 785408   ;;  %s557_s6 = sshll.u32 (!%p141_p9), %s843_s16, 8 }
  0x11   : > { %643 = vmatpush3.bf16.msra.mxu0 (!%p141_p9), %v640_v5  ;;  %v652_v14 = vpack.c.bf16 (!%p141_p9), %v218_v13, %v217_v12  ;;  %v656_v19 = vpack.c.bf16 (!%p141_p9), %v220_v16, %v219_v15  ;;  %v221_v20 = vld [vmem:[%s1034_s1 + $0x50] sm:$0xff] (!%p141_p9)  ;;  %v222_v21 = vld [vmem:[%s1034_s1 + $0x58] sm:$0xff] (!%p141_p9)  ;;  %v537_v35 = vld [vmem:[%s1034_s1 + $0x60] sm:$0xff] (!%p141_p9)  ;;  %s986_s11 = scalar_lea.hbm (!%p141_p9), %s1036_s3, %s557_s6 }
  0x12   : > { %645 = vmatprep.subr.bf16.mxu0 (!%p141_p9), %v644_v6  ;;  %v660_v24 = vpack.c.bf16 (!%p141_p9), %v222_v21, %v221_v20  ;;  %v538_v36 = vld [vmem:[%s1034_s1 + $0x68] sm:$0xff] (!%p141_p9)  ;;  %v539_v37 = vld [vmem:[%s1034_s1 + $0x70] sm:$0xff] (!%p141_p9)  ;;  %v540_v39 = vld [vmem:[%s1034_s1 + $0x78] sm:$0xff] (!%p141_p9) }
  0x13   : > { %v664_v38 = vpack.c.bf16 (!%p141_p9), %v538_v36, %v537_v35  ;;  %v668_v40 = vpack.c.bf16 (!%p141_p9), %v540_v39, %v539_v37  ;;  %v541_v41 = vld [vmem:[%s1034_s1 + $0x80] sm:$0xff] (!%p141_p9)  ;;  %v542_v42 = vld [vmem:[%s1034_s1 + $0x88] sm:$0xff] (!%p141_p9)  ;;  %v543_v44 = vld [vmem:[%s1034_s1 + $0x90] sm:$0xff] (!%p141_p9) }
  0x14   : > { %v672_v43 = vpack.c.bf16 (!%p141_p9), %v542_v42, %v541_v41  ;;  %v544_v45 = vld [vmem:[%s1034_s1 + $0x98] sm:$0xff] (!%p141_p9)  ;;  %v545_v47 = vld [vmem:[%s1034_s1 + $0xa0] sm:$0xff] (!%p141_p9)  ;;  %v546_v48 = vld [vmem:[%s1034_s1 + $0xa8] sm:$0xff] (!%p141_p9) }
  0x15   : > { %s165_s5 = scalar_select %p164_p10, %s843_s16, 1  ;;  %647 = vmatpush3.bf16.msra.mxu0 %v644_v6  ;;  %665 = vmatprep.subr.bf16.mxu1 %v664_v38  ;;  %v676_v46 = vpack.c.bf16 %v544_v45, %v543_v44  ;;  %v680_v49 = vpack.c.bf16 %v546_v48, %v545_v47  ;;  %v532_v50 = vld [vmem:[%s1035_s2] ss:$0 sm:$0xff]  ;;  %v547_v56 = vld [vmem:[%s1034_s1 + $0xb0] sm:$0xff]  ;;  %v548_v57 = vld [vmem:[%s1034_s1 + $0xb8] sm:$0xff] }
  0x16   : > { %649 = vmatprep.subr.bf16.mxu0 %v648_v11  ;;  %667 = vmatpush3.bf16.msra.mxu1 %v664_v38  ;;  %v684_v59 = vpack.c.bf16 %v548_v57, %v547_v56  ;;  %v536_v12 = vld [vmem:[%s1035_s2 + $0x1] ss:$0 sm:$0xff] }
  0x17   : > { %s556_s10 = sshll.u32 %s165_s5, 4  ;;  %s798_s5 = smov 64   ;;  %669 = vmatprep.subr.bf16.mxu1 %v668_v40 }
  0x18   : > { %s168_s19 = scalar_lea.vmem %s1033_s0, %s556_s10 }
  0x19   : > { %v172_v9 = vld [vmem:[%s168_s19] sm:$0xff]  ;;  %v173_v10 = vld [vmem:[%s168_s19 + $0x8] sm:$0xff]  ;;  %651 = vmatpush3.bf16.msra.mxu0 %v648_v11  ;;  %s799_s19 = smov [#allocation3]  }
  0x1a   : > { %175 = vst.msk [vmem:[#allocation2 + $0x8] sm:$0xff] %vm174_vm1, %v172_v9  ;;  %176 = vst.msk [vmem:[#allocation2 + $0x10] sm:$0xff] %vm174_vm1, %v173_v10  ;;  %653 = vmatprep.subr.bf16.mxu0 %v652_v14  ;;  %671 = vmatpush3.bf16.msra.mxu1 %v668_v40  ;;  %s736_s20 = sshll.u32 %s799_s19, 4  ;;  %s737_s20 = int_to_ptr.vmem [resolvable:$false] %s736_s20 }
  0x1b   : > { %673 = vmatprep.subr.bf16.mxu1 %v672_v43  ;;  %s738_s24 = scalar_lea.vmem %s737_s20, 512 }
  0x1d   : > { %655 = vmatpush3.bf16.msra.mxu0 %v652_v14 }
  0x1e   : > { %657 = vmatprep.subr.bf16.mxu0 %v656_v19  ;;  %675 = vmatpush3.bf16.msra.mxu1 %v672_v43 }
  0x1f   : > { %677 = vmatprep.subr.bf16.mxu1 %v676_v46 }
  0x21   : > { %v907_v17 = vld [vmem:[#allocation2 + $0x8] sm:$0xff]  ;;  %v187_v22 = vld [vmem:[#allocation2 + $0x10] sm:$0xff]  ;;  %659 = vmatpush3.bf16.msra.mxu0 %v656_v19 }
  0x22   : > { %v188_v18 = vld [vmem:[#allocation2 + $0x9] sm:$0xff]  ;;  %192 = vrot.lane.b32.xlu0 %v907_v17, %s797_s4  ;;  %v189_v23 = vld [vmem:[#allocation2 + $0x11] sm:$0xff]  ;;  %661 = vmatprep.subr.bf16.mxu0 %v660_v24 }
  0x23   : > { %200 = vrot.lane.b32.xlu1 %v188_v18, %s798_s5  ;;  %v184_v25 = vld [vmem:[#allocation2 + $0x7] sm:$0xff]  ;;  %v185_v30 = vld [vmem:[#allocation2 + $0xf] sm:$0xff]  ;;  %679 = vmatpush3.bf16.msra.mxu1 %v676_v46 }
  0x24   : > { %681 = vmatprep.subr.bf16.mxu1 %v680_v49 }
  0x25   : > { %663 = vmatpush3.bf16.msra.mxu0 %v660_v24 }
  0x26   : > { %194 = vrot.lane.b32.xlu0 %v187_v22, %s797_s4 }
  0x27   : > { %202 = vrot.lane.b32.xlu1 %v189_v23, %s798_s5  ;;  %683 = vmatpush3.bf16.msra.mxu1 %v680_v49 }
  0x28   : > { %685 = vmatprep.subr.bf16.mxu1 %v684_v59 }
  0x2b   : > { %687 = vmatpush3.bf16.msra.mxu1 %v684_v59 }
  0x94   : > { %v193_v26 = vpop.permute.xlu0 %192 }
  0x95   : > { %v201_v27 = vpop.permute.xlu1 %200  ;;  %v206_v28 = vsel %vm174_vm1, %v184_v25, %v193_v26 }
  0x96   : > { %v209_v29 = vsel %vm208_vm2, %v206_v28, %v201_v27 }
  0x97   : > { %610 = vmatprep.mubr.msk.f32.mxu0 %vm223_vm3, %v209_v29 }
  0x98   : > { %v195_v31 = vpop.permute.xlu0 %194 }
  0x99   : > { %v203_v32 = vpop.permute.xlu1 %202  ;;  %v207_v33 = vsel %vm174_vm1, %v185_v30, %v195_v31 }
  0x9a   : > { %v210_v34 = vsel %vm208_vm2, %v207_v33, %v203_v32 }
  0x9b   : > { %611 = vmatmul.mubr.msk.f32.vlgmr.msra.gmra.mrb[0].mxu0 %vm223_vm3, %v210_v34 }
 0x16e   : > { %v612_v51 = vpop.f32.mrb[0].mxu0 }
 0x16f   : > { %v306_v52 = vadd.f32 %v612_v51, %v532_v50  ;;  %v296_v53 = vpop.f32.mrb[1].mxu0 }
 0x170   : > { %v305_v54 = vadd.f32 %v532_v50, %v296_v53 }
 0x171   : > { %v308_v55 = vmax.f32 %v306_v52, 0.0 }
 0x172   : > { %v307_v58 = vmax.f32 %v305_v54, 0.0 }
 0x173   : > { %v310_v60 = vadd.f32 %v308_v55, %v187_v22 }
 0x174   : > { %v309_v61 = vadd.f32 %v307_v58, %v907_v17 }
 0x175   : > { %312 = vst.msk [vmem:[#allocation2 + $0x10] sm:$0xff] %vm174_vm1, %v310_v60 }
 0x176   : > { %311 = vst.msk [vmem:[#allocation2 + $0x8] sm:$0xff] %vm174_vm1, %v309_v61 }
 0x17c   : > { %v324_v62 = vld [vmem:[#allocation2 + $0x10] sm:$0xff] }
 0x17d   : > { %331 = vrot.lane.b32.xlu1 %v324_v62, %s797_s4  ;;  %v323_v63 = vld [vmem:[#allocation2 + $0x8] sm:$0xff]  ;;  %v326_v0 = vld [vmem:[#allocation2 + $0x11] sm:$0xff] }
 0x17e   : > { %329 = vrot.lane.b32.xlu0 %v323_v63, %s797_s4  ;;  %v325_v1 = vld [vmem:[#allocation2 + $0x9] sm:$0xff]  ;;  %s161_s4 = sand.u32 1, %s786_s13  }
 0x17f   : > { %v321_v4 = vld [vmem:[#allocation2 + $0x7] sm:$0xff]  ;;  %v322_v6 = vld [vmem:[#allocation2 + $0xf] sm:$0xff]  ;;  %s992_s16 = scalar_lea.sflag [#allocation4], %s161_s4 }
 0x181   : > { %339 = vrot.lane.b32.xlu1 %v326_v0, %s798_s5 }
 0x182   : > { %337 = vrot.lane.b32.xlu0 %v325_v1, %s798_s5  ;;  %s529_s5 = sshll.u32 %s161_s4, 4 }
 0x183   : > { %s163_s7 = scalar_lea.vmem [#allocation3], %s529_s5 }
 0x184   : > { %s463_s8 = sshll.u32 %s163_s7, 4  ;;  %s988_s8 = int_to_ptr.vmem [resolvable:$true] %s463_s8 }
 0x185   : > { %s732_s17 = scalar_lea.vmem %s988_s8, 256  ;;  %p739_p0 = scmp.lt.s32.totalorder %s988_s8, %s737_s20 }
 0x186   : > { %p733_p11 = scmp.ne.s32.totalorder %s988_s8, %s732_s17  ;;  %p740_p1 = scmp.lt.s32.totalorder %s738_s24, %s732_s17 }
 0x188   : > { %p734_p12 = pnand %p733_p11, %p860_p5  ;;  %p741_p2 = por %p740_p1, %p739_p0 }
 0x18a   : > { %p735_p13 = pneg %p734_p12 }
 0x18c   : > { %p742_p3 = pnand %p741_p2, %p735_p13 }
 0x1ef   : > { %v332_v2 = vpop.permute.xlu1 %331 }
 0x1f0   : > { %v330_v3 = vpop.permute.xlu0 %329  ;;  %v344_v9 = vsel %vm174_vm1, %v322_v6, %v332_v2 }
 0x1f1   : > { %v343_v7 = vsel %vm174_vm1, %v321_v4, %v330_v3 }
 0x1f3   : > { %v340_v5 = vpop.permute.xlu1 %339 }
 0x1f4   : > { %v338_v8 = vpop.permute.xlu0 %337  ;;  %v346_v11 = vsel %vm208_vm2, %v344_v9, %v340_v5 }
 0x1f5   : > { %v345_v10 = vsel %vm208_vm2, %v343_v7, %v338_v8 }
 0x1f6   : > { %637 = vmatprep.mubr.msk.f32.mxu1 %vm223_vm3, %v345_v10 }
 0x1f7   : > { %638 = vmatmul.mubr.msk.f32.vlgmr.msra.gmra.mrb[0].mxu1 %vm223_vm3, %v346_v11 }
 0x2ca   : > { %v639_v13 = vpop.f32.mrb[0].mxu1 }
 0x2cb   : > { %v442_v14 = vadd.f32 %v639_v13, %v536_v12  ;;  %v432_v15 = vpop.f32.mrb[1].mxu1 }
 0x2cc   : > { %v441_v16 = vadd.f32 %v536_v12, %v432_v15 }
 0x2cd   : > { %v444_v17 = vmax.f32 %v442_v14, 0.0 }
 0x2ce   : > { %v443_v18 = vmax.f32 %v441_v16, 0.0 }
 0x2cf   : > { %v446_v19 = vadd.f32 %v444_v17, %v324_v62 }
 0x2d0   : > { %v445_v20 = vadd.f32 %v443_v18, %v323_v63 }
 0x2d1   : > { %448 = vst.msk [vmem:[%s163_s7 + $0x8] sm:$0xff] %vm174_vm1, %v446_v19 }
 0x2d2   : > { %447 = vst.msk [vmem:[%s163_s7] sm:$0xff] %vm174_vm1, %v445_v20 }
 0x2d3   : > { %745 = shalt.err (!%p742_p3)
}
 0x2d4   : > { %s746_s25 = scalar_lea.hbm %s986_s11, 256  ;;  %s750_s28 = scalar_lea.hbm %s1036_s3, 512 }
 0x2d5   : > { %p747_p4 = scmp.ne.s32.totalorder %s986_s11, %s746_s25  ;;  %p751_p9 = scmp.lt.u32.totalorder %s986_s11, %s1036_s3 }
 0x2d6   : > { %p752_p10 = scmp.lt.u32.totalorder %s750_s28, %s746_s25  ;;  %p754_p12 = scmp.lt.u32.totalorder %s746_s25, %s986_s11 }
 0x2d7   : > { %p748_p7 = pnand %p747_p4, %p860_p5 }
 0x2d8   : > { %p753_p11 = por %p752_p10, %p751_p9 }
 0x2d9   : > { %p749_p8 = pneg %p748_p7 }
 0x2da   : > { %p755_p13 = por %p754_p12, %p753_p11 }
 0x2dc   : > { %p756_p0 = pnand %p755_p13, %p749_p8 }
 0x2de   : > { %759 = shalt.err (!%p756_p0)
}
 0x2df   : > { %s800_s29 = smov 128   ;;  %s801_s30 = smov 8  }
 0x2e0   : > { %688 = dma.vmem_to_hbm [thread:$0]  (%p860_p5), %s988_s8, 256, %s986_s11, %s992_s16, %s800_s29, %s800_s29, %s801_s30  }
 0x2e1 PF: > { %p694_p1 = scmp.ge.s32.totalorder %s794_s15, 2  ;;  %s478_s6 = sand.u32 1, %s782_s12  }
 0x2e2   : > { %s479_s7 = scalar_lea.sflag [#allocation4], %s478_s6 }
 0x2e3   : > { %p691_p2 = pnand %p694_p1, %p864_p6 }
 0x2e5   : > { %777 = dma.done.wait (!%p691_p2), %s479_s7, 256  }
 0x2e6   : > { %779 = vsyncadd (!%p691_p2), %s479_s7, 4294967040  ;;  %p13_p3 = scmp.ge.s32.totalorder %s847_s18, 4   ;;  %s1039_s12 = smov %s786_s13 }
 0x2e7   : > { %s1040_s13 = smov %s790_s14  ;;  %s1041_s14 = smov %s858_s21 }
 0x2e8   : > { %s1042_s15 = smov %s847_s18  ;;  %15 = sbr.rel (!%p13_p3) target bundleno = 3 (0x3), region = 69 }
 0x2ef   :  { %484 = vsyncpa [#allocation4], 1 }
 0x2f0   :  { %486 = vsyncpa [#allocation4 + $0x1], 1 }

</bundles_post_ra>
